<compile_context>
chip_gen: v5e
topology: v5e:2x2
jax: 0.10.0
libtpu: 0.0.40
codegen_flags: <defaults>
</compile_context>

<pallas_src>
import math

import jax
import jax.numpy as jnp
from jax.experimental import pallas as pl
from jax.experimental.pallas import tpu as pltpu


def _round_up(a: int, b: int) -> int:
    return ((a + b - 1) // b) * b


# --------------------------------------------------------------------------
# Kernels
# --------------------------------------------------------------------------
def _linear_kernel_single_k(x_ref, w_ref, b_ref, o_ref):
    # x_ref: (tm, tk)  w_ref: (tk, tn)  b_ref: (1, tn)  o_ref: (tm, tn)
    acc = jnp.dot(x_ref[...], w_ref[...], preferred_element_type=jnp.float32)
    o_ref[...] = (acc + b_ref[...].astype(jnp.float32)).astype(o_ref.dtype)


def _linear_kernel_multi_k(x_ref, w_ref, b_ref, o_ref, acc_ref):
    # Same tiles as above plus a resident f32 accumulator (tm, tn).
    k = pl.program_id(2)

    @pl.when(k == 0)
    def _():
        acc_ref[...] = jnp.zeros_like(acc_ref)

    acc_ref[...] += jnp.dot(x_ref[...], w_ref[...],
                            preferred_element_type=jnp.float32)

    @pl.when(k == pl.num_programs(2) - 1)
    def _():
        o_ref[...] = (acc_ref[...] + b_ref[...].astype(jnp.float32)).astype(o_ref.dtype)


# --------------------------------------------------------------------------
# Parameter preparation (done once; weights are static)
# --------------------------------------------------------------------------
def prepare_parallel_linear_params(weight, bias, *, tn=512, tk=1024, dtype=None):
    """Pre-transpose + pre-pad the static parameters once.

    weight: (out_size, in_size)  (PyTorch / megatron convention)
    bias:   (out_size,) or None
    Returns (wT_p, b_p) with wT_p of shape (Kp, Np) = padded (in, out) and
    b_p of shape (1, Np).  Use the same tn/tk here and in the forward call.
    """
    out_size, in_size = weight.shape
    if dtype is not None:
        weight = weight.astype(dtype)

    tn_e = min(_round_up(tn, 128), _round_up(out_size, 128))
    tk_e = min(_round_up(tk, 128), _round_up(in_size, 128))
    Np = _round_up(out_size, tn_e)
    Kp = _round_up(in_size, tk_e)

    wT = weight.T  # (K, N), one-time HBM copy
    if (Kp, Np) != (in_size, out_size):
        wT = jnp.pad(wT, ((0, Kp - in_size), (0, Np - out_size)))

    if bias is None:
        b = jnp.zeros((out_size,), wT.dtype)
    else:
        b = bias.astype(dtype) if dtype is not None else bias
    if Np != out_size:
        b = jnp.pad(b, (0, Np - out_size))
    return wT, b.reshape(1, Np)


# --------------------------------------------------------------------------
# Forward
# --------------------------------------------------------------------------
def parallel_linear_forward(x, wT_p, b_p, out_size, *, tm=256, tn=512, tk=1024):
    """y = x @ W^T + b with prepared (pre-transposed, pre-padded) params.

    x:      (..., in_size)
    wT_p:   (Kp, Np)  from prepare_parallel_linear_params
    b_p:    (1, Np)
    out_size: the original (unpadded) output width.
    """
    in_size = x.shape[-1]
    lead_shape = x.shape[:-1]
    x2d = x.reshape(-1, in_size)                     # (M, K)
    M = x2d.shape[0]
    Kp, Np = wT_p.shape
    N = out_size
    assert Np >= N and Kp >= in_size, "prepared params too small for this input"

    x_item = jnp.dtype(x.dtype).itemsize
    w_item = jnp.dtype(wT_p.dtype).itemsize
    b_item = jnp.dtype(b_p.dtype).itemsize
    out_item = x_item
    min_sublane = max(8, 32 // x_item)               # 8 f32, 16 bf16, 32 int8

    # Effective tiles: respect (sublane, 128) minima, clamp to the problem.
    tm_e = min(_round_up(tm, min_sublane), _round_up(M, min_sublane))
    tn_e = min(_round_up(tn, 128), Np)
    tk_e = min(_round_up(tk, 128), Kp)
    if Kp % tk_e != 0:
        # Tile mismatch vs. the padding chosen at prepare time: fall back to a
        # single K step (always correct; pass matching tk to avoid this).
        tk_e = Kp

    grid_m = pl.cdiv(M, tm_e)
    grid_n = pl.cdiv(N, tn_e)
    grid_k = Kp // tk_e

    # v7x has 2 TensorCores: if both parallel axes collapsed to one tile,
    # split the N axis so the grid can shard across cores.
    if grid_m == 1 and grid_n == 1 and tn_e > 128:
        tn_e = max(128, _round_up(tn_e // 2, 128))
        grid_n = pl.cdiv(N, tn_e)

    # Only the K axis of x needs zero padding (padded weight rows are zero,
    # but OOB garbage in x could be NaN/Inf, so real zeros are required).
    x_p = x2d if Kp == in_size else jnp.pad(x2d, ((0, 0), (0, Kp - in_size)))

    # Decode-like (single M tile, weight-streaming) calls are HBM-bound on
    # the weight stream on v5e/v6e: buffer the weight 3-deep.
    nbuf_w = 3 if (grid_m == 1 and grid_k > 1) else 2

    x_spec = pl.BlockSpec((tm_e, tk_e), lambda i, j, k: (i, k))
    if nbuf_w > 2:
        try:
            w_spec = pl.BlockSpec((tk_e, tn_e), lambda i, j, k: (k, j),
                                  pipeline_mode=pl.Buffered(nbuf_w))
        except TypeError:  # pipeline_mode unsupported -> default double buffer
            w_spec = pl.BlockSpec((tk_e, tn_e), lambda i, j, k: (k, j))
    else:
        w_spec = pl.BlockSpec((tk_e, tn_e), lambda i, j, k: (k, j))
    b_spec = pl.BlockSpec((1, tn_e), lambda i, j, k: (0, j))
    out_spec = pl.BlockSpec((tm_e, tn_e), lambda i, j, k: (i, j))

    if grid_k == 1:
        kernel = _linear_kernel_single_k
        scratch = []
    else:
        kernel = _linear_kernel_multi_k
        scratch = [pltpu.VMEM((tm_e, tn_e), jnp.float32)]

    # Advisory cost (includes re-streaming: x read once per N tile, W once per
    # M tile).
    n_cov = grid_n * tn_e
    cost = pl.CostEstimate(
        flops=2 * M * Kp * n_cov,
        transcendentals=0,
        bytes_accessed=int(grid_n * M * Kp * x_item
                           + grid_m * Kp * n_cov * w_item
                           + M * N * out_item
                           + grid_m * grid_k * n_cov * b_item),
    )

    # Generation-aware scoped-VMEM budget (double/triple-buffered inputs,
    # double-buffered output, f32 accumulator).
    step_bytes = (2 * tm_e * tk_e * x_item
                  + nbuf_w * tk_e * tn_e * w_item
                  + 2 * tn_e * b_item
                  + 2 * tm_e * tn_e * out_item
                  + (0 if grid_k == 1 else tm_e * tn_e * 4))
    try:
        cap = int(getattr(pltpu.get_tpu_info(), "vmem_capacity_bytes", 64 << 20))
    except Exception:  # info unavailable (e.g. interpret mode): assume v7x
        cap = 64 << 20
    vmem_limit = max(32 << 20, 2 * step_bytes + (8 << 20))
    vmem_limit = min(vmem_limit, int(0.75 * cap))     # ~96 MiB v5e/v6e, ~48 MiB v7x
    vmem_limit = min(max(vmem_limit, step_bytes + (4 << 20)), cap)

    out = pl.pallas_call(
        kernel,
        out_shape=jax.ShapeDtypeStruct((M, N), x.dtype),
        grid_spec=pltpu.PrefetchScalarGridSpec(
            num_scalar_prefetch=0,
            grid=(grid_m, grid_n, grid_k),
            in_specs=[x_spec, w_spec, b_spec],
            out_specs=out_spec,
            scratch_shapes=scratch,
        ),
        compiler_params=pltpu.CompilerParams(
            dimension_semantics=("parallel", "parallel", "arbitrary"),
            vmem_limit_bytes=int(vmem_limit),
        ),
        cost_estimate=cost,
    )(x_p, wT_p, b_p)

    return out.reshape(*lead_shape, out_size)


def parallel_linear(x, weight, bias=None, *, tm=256, tn=512, tk=1024):
    """One-shot convenience: prepares params per call (prefer preparing once)."""
    wT_p, b_p = prepare_parallel_linear_params(weight, bias, tn=tn, tk=tk)
    return parallel_linear_forward(x, wT_p, b_p, weight.shape[0], tm=tm, tn=tn, tk=tk)


def init_parallel_linear_params(key, in_size, out_size, dtype=jnp.float32):
    """kaiming_uniform_(a=sqrt(5))-style init for W, matching uniform for b."""
    kw, kb = jax.random.split(key)
    bound = 1.0 / math.sqrt(in_size)
    weight = jax.random.uniform(kw, (out_size, in_size), dtype, minval=-bound, maxval=bound)
    bias = jax.random.uniform(kb, (out_size,), dtype, minval=-bound, maxval=bound)
    return weight, bias


if __name__ == "__main__":
    key = jax.random.PRNGKey(0)
    k1, k2, k3, k4, k5, k6 = jax.random.split(key, 6)

    # --- 1. tiny shapes, single-K fast path (in < out: ColumnParallel path) --
    batch, seq, in_size, out_size = 2, 8, 32, 64
    x = jax.random.normal(k1, (batch, seq, in_size), jnp.float32)
    w, b = init_parallel_linear_params(k2, in_size, out_size)
    y = jax.block_until_ready(parallel_linear(x, w, b))
    y_ref = jnp.einsum("bsk,nk->bsn", x, w) + b
    assert y.shape == (batch, seq, out_size)
    assert jnp.allclose(y, y_ref, atol=1e-4, rtol=1e-4), "test1 mismatch"

    # --- 2. full 3-D grid, K accumulator, partial M/N edge tiles (in > out) --
    batch2, seq2, in2, out2 = 2, 100, 1024, 384
    x2 = jax.random.normal(k3, (batch2, seq2, in2), jnp.float32)
    w2, b2 = init_parallel_linear_params(k4, in2, out2)
    wT2, bb2 = prepare_parallel_linear_params(w2, b2, tn=256, tk=256)
    y2 = jax.block_until_ready(
        parallel_linear_forward(x2, wT2, bb2, out2, tm=128, tn=256, tk=256))
    y2_ref = jnp.einsum("bsk,nk->bsn", x2, w2) + b2
    assert y2.shape == (batch2, seq2, out2)
    assert jnp.allclose(y2, y2_ref, atol=1e-3, rtol=1e-3), "test2 mismatch"

    # --- 3. decode-like: single M tile, streamed weight, Buffered(3) path ----
    batch3, seq3, in3, out3 = 1, 8, 512, 256
    x3 = jax.random.normal(k5, (batch3, seq3, in3), jnp.float32)
    w3, b3 = init_parallel_linear_params(k6, in3, out3)
    wT3, bb3 = prepare_parallel_linear_params(w3, b3, tn=128, tk=128)
    y3 = jax.block_until_ready(
        parallel_linear_forward(x3, wT3, bb3, out3, tm=256, tn=128, tk=128))
    y3_ref = jnp.einsum("bsk,nk->bsn", x3, w3) + b3
    assert y3.shape == (batch3, seq3, out3)
    assert jnp.allclose(y3, y3_ref, atol=1e-3, rtol=1e-3), "test3 mismatch"

    print("KERNEL_OK")
</pallas_src>

<mosaic_0001>
module attributes {stable_mosaic.version = 11 : i64} {
  func.func @_linear_kernel_single_k(%arg0: i32, %arg1: i32, %arg2: i32, %arg3: memref<16x128xf32, #tpu.memory_space<vmem>>, %arg4: memref<128x128xf32, #tpu.memory_space<vmem>>, %arg5: memref<1x128xf32, #tpu.memory_space<vmem>>, %arg6: memref<16x128xf32, #tpu.memory_space<vmem>>) attributes {dimension_semantics = [#tpu.dimension_semantics<parallel>, #tpu.dimension_semantics<parallel>, #tpu.dimension_semantics<arbitrary>], iteration_bounds = array<i64: 1, 1, 1>, scalar_prefetch = 0 : i64, scratch_operands = 0 : i64, tpu.core_type = #tpu.core_type<tc>, window_params = [{transform_indices = @transform_0, window_bounds = array<i64: 16, 128>}, {transform_indices = @transform_1, window_bounds = array<i64: 128, 128>}, {transform_indices = @transform_2, window_bounds = array<i64: 1, 128>}, {transform_indices = @transform_3, window_bounds = array<i64: 16, 128>}]} {
    %c0 = arith.constant 0 : index
    %c0_0 = arith.constant 0 : index
    %0 = vector.load %arg3[%c0, %c0_0] : memref<16x128xf32, #tpu.memory_space<vmem>>, vector<16x128xf32>
    %c0_1 = arith.constant 0 : index
    %c0_2 = arith.constant 0 : index
    %1 = vector.load %arg4[%c0_1, %c0_2] : memref<128x128xf32, #tpu.memory_space<vmem>>, vector<128x128xf32>
    %cst = arith.constant dense<0.000000e+00> : vector<16x128xf32>
    %2 = tpu.matmul %0, %1, %cst {dimension_numbers = #tpu.dot_dimension_numbers<[1], [0], [0], [1], [0, 0, 1, 1], [], []>} : vector<16x128xf32>, vector<128x128xf32>, vector<16x128xf32> -> vector<16x128xf32>
    %c0_3 = arith.constant 0 : index
    %c0_4 = arith.constant 0 : index
    %3 = vector.load %arg5[%c0_3, %c0_4] : memref<1x128xf32, #tpu.memory_space<vmem>>, vector<1x128xf32>
    %4 = vector.broadcast %3 : vector<1x128xf32> to vector<16x128xf32>
    %5 = arith.addf %2, %4 : vector<16x128xf32>
    %c0_5 = arith.constant 0 : index
    %c0_6 = arith.constant 0 : index
    %6 = vector.load %arg6[%c0_5, %c0_6] : memref<16x128xf32, #tpu.memory_space<vmem>>, vector<16x128xf32>
    tpu.vector_store %arg6[%c0_5, %c0_6], %5 {strides = array<i32>} : memref<16x128xf32, #tpu.memory_space<vmem>>, vector<16x128xf32>,
    return
  }
  func.func @transform_0(%arg0: i32, %arg1: i32, %arg2: i32) -> (i32, i32) {
    %c0_i32 = arith.constant 0 : i32
    return %arg0, %arg2 : i32, i32
  }
  func.func @transform_1(%arg0: i32, %arg1: i32, %arg2: i32) -> (i32, i32) {
    %c0_i32 = arith.constant 0 : i32
    return %arg2, %arg1 : i32, i32
  }
  func.func @transform_2(%arg0: i32, %arg1: i32, %arg2: i32) -> (i32, i32) {
    %c0_i32 = arith.constant 0 : i32
    %c0_i32_0 = arith.constant 0 : i32
    return %c0_i32, %arg1 : i32, i32
  }
  func.func @transform_3(%arg0: i32, %arg1: i32, %arg2: i32) -> (i32, i32) {
    %c0_i32 = arith.constant 0 : i32
    return %arg0, %arg1 : i32, i32
  }
}

</mosaic_0001>

<bundles_post_ra>
// kernel: tpu_custom_call.1
= control target key start
LH: loop header
LB: loop body
LE: loop exit
PB: predicated region body
PF: predicated region fallthrough
CT: control target
= control target key end

     0   :  { %8 = vsyncpa [#allocation3], 0  ;;  %s260_s0 = inlined_call_operand.hbm [shape: f32[16,128], index: 0, kind: input, shape index: {}]   ;;  %s261_s1 = inlined_call_operand.hbm [shape: f32[128,128], index: 1, kind: input, shape index: {}]   ;;  %s262_s2 = inlined_call_operand.vmem [shape: f32[1,128], index: 2, kind: input, shape index: {}]   ;;  %s263_s3 = inlined_call_operand.hbm [shape: f32[16,64], index: 3, kind: output, shape index: {}]  }
   0x1   :  { %9 = vsyncpa [#allocation6], 0 }
   0x2   :  { %10 = vsyncpa [#allocation4], 0  ;;  %s15_s14 = sshll.u32 %s260_s0, 4  ;;  %s214_s15 = smov [#allocation2]   ;;  %s16_s14 = int_to_ptr.hbm [resolvable:$true] %s15_s14 }
   0x3   :  { %s17_s16 = sshll.u32 %s214_s15, 4  ;;  %s28_s19 = sshll.u32 %s261_s1, 4  ;;  %s18_s16 = int_to_ptr.vmem [resolvable:$true] %s17_s16  ;;  %s29_s19 = int_to_ptr.hbm [resolvable:$true] %s28_s19 }
   0x4   :  { %s215_s20 = smov 128   ;;  %s216_s21 = smov 8  }
   0x5   :  { %23 = dma.hbm_to_vmem [thread:$0]  %s16_s14, 256, %s18_s16, [#allocation3], %s215_s20, %s215_s20, %s216_s21  }
   0x6   :  { %s217_s22 = smov [#allocation5]  }
   0x7   :  { %s30_s23 = sshll.u32 %s217_s22, 4  ;;  %s31_s23 = int_to_ptr.vmem [resolvable:$true] %s30_s23 }
   0x8   :  { %36 = dma.hbm_to_vmem [thread:$0]  %s29_s19, 2048, %s31_s23, [#allocation6], %s215_s20, %s215_s20, %s216_s21  }
   0x9   :  { %208 = dma.done.wait [#allocation3], 256  }
   0xa   :  { %209 = vsyncadd [#allocation3], 4294967040 }
   0xb   :  { %210 = dma.done.wait [#allocation6], 2048  }
   0xc   :  { %211 = vsyncadd [#allocation6], 4294965248  ;;  %v64_v0 = vld [vmem:[#allocation5 + $0x78] sm:$0xff]  ;;  %v63_v1 = vld [vmem:[#allocation5 + $0x70] sm:$0xff]  ;;  %s218_s24 = smov [#allocation7]   ;;  %s100_s28 = sshll.u32 %s263_s3, 4  ;;  %s101_s28 = int_to_ptr.hbm [resolvable:$true] %s100_s28 }
   0xd   :  { %69 = vmatpush.msra.mxu0 %v64_v0  ;;  %114 = vmatpush.msra.mxu1 %v64_v0  ;;  %v62_v2 = vld [vmem:[#allocation5 + $0x68] sm:$0xff]  ;;  %v61_v3 = vld [vmem:[#allocation5 + $0x60] sm:$0xff]  ;;  %v60_v4 = vld [vmem:[#allocation5 + $0x58] sm:$0xff]  ;;  %s98_s25 = sshll.u32 %s218_s24, 4  ;;  %s99_s25 = int_to_ptr.vmem [resolvable:$true] %s98_s25 }
   0xe   :  { %v59_v5 = vld [vmem:[#allocation5 + $0x50] sm:$0xff]  ;;  %v58_v6 = vld [vmem:[#allocation5 + $0x48] sm:$0xff]  ;;  %v57_v7 = vld [vmem:[#allocation5 + $0x40] sm:$0xff] }
   0xf   :  { %70 = vmatpush.msra.mxu0 %v63_v1  ;;  %115 = vmatpush.msra.mxu1 %v63_v1  ;;  %v56_v8 = vld [vmem:[#allocation5 + $0x38] sm:$0xff]  ;;  %v55_v9 = vld [vmem:[#allocation5 + $0x30] sm:$0xff]  ;;  %v54_v10 = vld [vmem:[#allocation5 + $0x28] sm:$0xff] }
  0x10   :  { %v53_v11 = vld [vmem:[#allocation5 + $0x20] sm:$0xff]  ;;  %v52_v12 = vld [vmem:[#allocation5 + $0x18] sm:$0xff]  ;;  %v51_v13 = vld [vmem:[#allocation5 + $0x10] sm:$0xff] }
  0x11   :  { %71 = vmatpush.msra.mxu0 %v62_v2  ;;  %116 = vmatpush.msra.mxu1 %v62_v2  ;;  %v50_v14 = vld [vmem:[#allocation5 + $0x8] sm:$0xff]  ;;  %v49_v15 = vld [vmem:[#allocation5] sm:$0xff]  ;;  %v47_v16 = vld [vmem:[#allocation2] sm:$0xff] }
  0x12   :  { %v48_v17 = vld [vmem:[#allocation2 + $0x8] sm:$0xff]  ;;  %v135_v18 = vld [vmem:[%s262_s2] ss:$0 sm:$0xff] }
  0x13   :  { %72 = vmatpush.msra.mxu0 %v61_v3  ;;  %117 = vmatpush.msra.mxu1 %v61_v3 }
  0x15   :  { %73 = vmatpush.msra.mxu0 %v60_v4  ;;  %118 = vmatpush.msra.mxu1 %v60_v4 }
  0x17   :  { %74 = vmatpush.msra.mxu0 %v59_v5  ;;  %119 = vmatpush.msra.mxu1 %v59_v5 }
  0x19   :  { %75 = vmatpush.msra.mxu0 %v58_v6  ;;  %120 = vmatpush.msra.mxu1 %v58_v6 }
  0x1b   :  { %76 = vmatpush.msra.mxu0 %v57_v7  ;;  %121 = vmatpush.msra.mxu1 %v57_v7 }
  0x1d   :  { %77 = vmatpush.msra.mxu0 %v56_v8  ;;  %122 = vmatpush.msra.mxu1 %v56_v8 }
  0x1f   :  { %78 = vmatpush.msra.mxu0 %v55_v9  ;;  %123 = vmatpush.msra.mxu1 %v55_v9 }
  0x21   :  { %79 = vmatpush.msra.mxu0 %v54_v10  ;;  %124 = vmatpush.msra.mxu1 %v54_v10 }
  0x23   :  { %80 = vmatpush.msra.mxu0 %v53_v11  ;;  %125 = vmatpush.msra.mxu1 %v53_v11 }
  0x25   :  { %81 = vmatpush.msra.mxu0 %v52_v12  ;;  %126 = vmatpush.msra.mxu1 %v52_v12 }
  0x27   :  { %82 = vmatpush.msra.mxu0 %v51_v13  ;;  %127 = vmatpush.msra.mxu1 %v51_v13 }
  0x29   :  { %83 = vmatpush.msra.mxu0 %v50_v14  ;;  %128 = vmatpush.msra.mxu1 %v50_v14 }
  0x2b   :  { %84 = vmatpush.msra.mxu0 %v49_v15  ;;  %129 = vmatpush.msra.mxu1 %v49_v15 }
  0x2c   :  { %85 = vmatmul.f32.vlgmr.msra.gmra.mxu0 %v47_v16  ;;  %88 = vmatmul.f32.vlgmr.msra.gmra.mxu1 %v48_v17 }
  0xa9   :  { %v86_v19 = vpop.f32.mrf.mxu0  ;;  %v89_v20 = vpop.f32.mrf.mxu1 }
  0xaa   :  { %v87_v21 = vadd.f32 %v135_v18, %v86_v19  ;;  %v90_v22 = vadd.f32 %v135_v18, %v89_v20 }
  0xac   :  { %92 = vst [vmem:[#allocation7] sm:$0xff] %v87_v21 }
  0xad   :  { %93 = vst [vmem:[#allocation7 + $0x8] sm:$0xff] %v90_v22 }
  0xae   :  { %106 = dma.vmem_to_hbm [thread:$0]  %s99_s25, 256, %s101_s28, [#allocation4], %s215_s20, %s215_s20, %s216_s21  }
  0xaf   :  { %212 = dma.done.wait [#allocation4], 256  }
  0xb0   :  { %213 = vsyncadd [#allocation4], 4294967040 }
  0xb1   :  { %111 = vsyncpa [#allocation3], 1 }
  0xb2   :  { %112 = vsyncpa [#allocation6], 1 }
  0xb3   :  { %113 = vsyncpa [#allocation4], 1 }

</bundles_post_ra>
